<compile_context>
chip_gen: v7x
topology: tpu7x:2x2x1
jax: 0.10.0
libtpu: 0.0.40
codegen_flags: <defaults>
</compile_context>

<pallas_src>
import functools
from typing import NamedTuple

import jax
import jax.numpy as jnp
from jax.experimental import pallas as pl
from jax.experimental.pallas import tpu as pltpu

_LANE = 128


def _round_up(n, m):
    return ((n + m - 1) // m) * m


def _pad2(a, rows, cols):
    r, c = a.shape
    return jnp.pad(a, ((0, rows - r), (0, cols - c)))


def _pick_tm(batch, block_m=256):
    """Largest batch tile with low padding waste; prefer >=2 grid steps."""
    b8 = _round_up(max(int(batch), 1), 8)
    tm = 8
    for cand in (256, 128, 64, 32, 16, 8):
        if cand > block_m:
            continue
        waste = _round_up(b8, cand) - b8
        if cand == 8 or waste * 4 <= b8:       # tolerate <=25% padded rows
            tm = cand
            break
    # Guarantee >=2 grid steps so "parallel" engages both TCs on v7x.
    while tm > 8 and _round_up(b8, tm) // tm < 2:
        tm //= 2
    return tm


def _vmem_capacity_bytes():
    """Generation-aware physical VMEM per TensorCore (v5e/v6e: 128 MiB, v7x: 64 MiB)."""
    try:
        info = pltpu.get_tpu_info()
        for attr in ("vmem_capacity_bytes", "vmem_bytes", "vmem_size_bytes"):
            cap = getattr(info, attr, None)
            if cap:
                return int(cap)
    except Exception:
        pass
    return 64 << 20   # conservative default (v7x per-TC VMEM)


class PreparedAutoEncoder(NamedTuple):
    weights: tuple      # per-layer bf16 [in_pad, out_pad], zero padded
    biases: jnp.ndarray  # f32 [n_layers, max_out_pad], zero padded
    dims: tuple          # per-layer (in, out) true dims
    pdims: tuple         # per-layer (in_pad, out_pad)
    relu_flags: tuple    # per-layer bool


def prepare_autoencoder_params(params, relu_flags, weight_dtype=jnp.bfloat16):
    """Pad / cast / pack parameters ONCE (hoisted out of the forward path).

    params = [w0, b0, w1, b1, ...] with wi: [in, out] (already transposed vs.
    PyTorch), bi: [1, out].  Zero padding keeps semantics exact: padded weight
    rows/cols and bias lanes are 0, ReLU(0)=0, 0-rows contribute 0 to the dot.
    """
    n_layers = len(params) // 2
    assert n_layers == len(relu_flags)
    dims = tuple((params[2 * i].shape[0], params[2 * i].shape[1])
                 for i in range(n_layers))
    pdims = tuple((_round_up(di, _LANE), _round_up(do, _LANE))
                  for di, do in dims)
    max_out = max(po for _, po in pdims)

    weights = []
    bias_rows = []
    for i in range(n_layers):
        w, b = params[2 * i], params[2 * i + 1]
        pin, pout = pdims[i]
        weights.append(_pad2(w.astype(weight_dtype), pin, pout))
        bias_rows.append(_pad2(b.reshape(1, -1).astype(jnp.float32), 1, max_out))
    biases = jnp.concatenate(bias_rows, axis=0)   # [n_layers, max_out_pad]

    return PreparedAutoEncoder(tuple(weights), biases, dims, pdims,
                               tuple(bool(f) for f in relu_flags))


def _autoencoder_kernel(relu_flags, pouts, x_ref, b_ref, *refs):
    """refs = (w0, w1, ..., out_ref).

    x_ref:   (tm, in_pad) bf16 activation tile.
    b_ref:   (n_layers, max_out_pad) f32 packed biases.
    w_refs:  (in_pad, out_pad) bf16 weights, resident (single-buffered).
    Accumulation is f32 on the MXU; bias + ReLU on the f32 accumulator;
    intermediates are stored as bf16, only the final store is f32.
    """
    out_ref = refs[-1]
    w_refs = refs[:-1]
    n_layers = len(w_refs)
    assert n_layers == len(relu_flags) == len(pouts)

    h = x_ref[...]                                    # bf16 (tm, in_pad)
    for i in range(n_layers):
        w = w_refs[i][...]                            # bf16 (in_pad, out_pad)
        pout = pouts[i]
        acc = jnp.dot(h, w, preferred_element_type=jnp.float32)
        acc = acc + b_ref[i:i + 1, 0:pout]            # f32 (1, pout) broadcast
        if relu_flags[i]:
            acc = jnp.maximum(acc, 0.0)
        h = acc.astype(jnp.bfloat16) if i + 1 < n_layers else acc
    out_ref[...] = h.astype(out_ref.dtype)


def functional_autoencoder_forward(x, prepared, *, block_m=256):
    """x: [batch, input_size] f32.  prepared: PreparedAutoEncoder (pre-padded)."""
    batch, input_size = x.shape
    weights, biases, dims, pdims, relu_flags = prepared
    n_layers = len(weights)
    assert input_size == dims[0][0]

    f_in = pdims[0][0]
    f_out = pdims[-1][1]
    out_size = dims[-1][1]
    max_out = max(po for _, po in pdims)

    # Batch tiling: low padding waste, >=2 grid steps when batch allows.
    tm = _pick_tm(batch, block_m)
    batch_pad = _round_up(batch, tm)

    # bf16 activations at the HBM boundary (half the DMA bytes / x-tile VMEM).
    x_pad = jnp.pad(x, ((0, batch_pad - batch),
                        (0, f_in - input_size))).astype(jnp.bfloat16)

    grid = (batch_pad // tm,)

    in_specs = [
        # Activation tile: pipelined across batch tiles (default double buffer).
        # (On v5e, sweeping pipeline_mode=pl.Buffered(3) here may help hide DMA.)
        pl.BlockSpec((tm, f_in), lambda i: (i, 0)),
        # Packed biases: constant index map -> single buffer.
        pl.BlockSpec(biases.shape, lambda i: (0, 0),
                     pipeline_mode=pl.Buffered(1)),
    ]
    for w in weights:
        # Weights resident across batch tiles: constant index map, single buffer.
        in_specs.append(pl.BlockSpec(w.shape, lambda i: (0, 0),
                                     pipeline_mode=pl.Buffered(1)))
    out_specs = pl.BlockSpec((tm, f_out), lambda i: (i, 0))

    # VMEM / cost bookkeeping (generation-aware cap; accounts for buffering).
    param_bytes = (sum(int(w.size) * w.dtype.itemsize for w in weights)
                   + int(biases.size) * biases.dtype.itemsize)
    act_bytes = (2 * tm * f_in * 2            # double-buffered bf16 x tiles
                 + 2 * tm * f_out * 4         # double-buffered f32 out tiles
                 + 3 * tm * max_out * 4)      # f32 accumulator / bf16 h slabs
    cap = _vmem_capacity_bytes()
    vmem_limit = max(param_bytes + act_bytes + (8 << 20), 32 << 20)
    vmem_limit = int(min(vmem_limit, cap - (2 << 20)))
    vmem_limit = max(vmem_limit, 16 << 20)

    flops = 2 * batch_pad * sum(pi * po for pi, po in pdims)
    bytes_accessed = (int(x_pad.size) * x_pad.dtype.itemsize
                      + batch_pad * f_out * 4 + param_bytes)

    kernel = functools.partial(_autoencoder_kernel,
                               tuple(relu_flags),
                               tuple(po for _, po in pdims))
    out_padded = pl.pallas_call(
        kernel,
        out_shape=jax.ShapeDtypeStruct((batch_pad, f_out), jnp.float32),
        grid=grid,
        in_specs=in_specs,
        out_specs=out_specs,
        compiler_params=pltpu.CompilerParams(
            dimension_semantics=("parallel",),
            vmem_limit_bytes=vmem_limit),
        cost_estimate=pl.CostEstimate(
            flops=int(flops), transcendentals=0,
            bytes_accessed=int(bytes_accessed)),
    )(x_pad, biases, *weights)

    return out_padded[:batch, :out_size]


def init_autoencoder_params(key, input_size, latent_size, layer_num, layer_size):
    """Deterministic init mirroring the PyTorch module's layer structure.

    Returns (params, relu_flags), params = [w, b, w, b, ...] with w: [in, out]
    (transposed vs. PyTorch), b: [1, out], in the order
    en_fc1, en_layers[*], en_fc2, de_fc1, de_layers[*], de_fc2.
    """
    layer_dims = [(input_size, layer_size)]                 # en_fc1   (ReLU)
    layer_dims += [(layer_size, layer_size)] * layer_num    # en_layers (ReLU)
    layer_dims += [(layer_size, latent_size)]               # en_fc2   (no ReLU)
    layer_dims += [(latent_size, layer_size)]               # de_fc1   (ReLU)
    layer_dims += [(layer_size, layer_size)] * layer_num    # de_layers (ReLU)
    layer_dims += [(layer_size, input_size)]                # de_fc2   (no ReLU)

    relu_flags = ([True] + [True] * layer_num + [False] +
                  [True] + [True] * layer_num + [False])

    params = []
    for fan_in, fan_out in layer_dims:
        key, kw, kb = jax.random.split(key, 3)
        bound = 1.0 / float(fan_in) ** 0.5
        w = jax.random.uniform(kw, (fan_in, fan_out), jnp.float32,
                               minval=-bound, maxval=bound)
        b = jax.random.uniform(kb, (1, fan_out), jnp.float32,
                               minval=-bound, maxval=bound)
        params += [w, b]
    return params, relu_flags


def reference_forward(x, params, relu_flags, weight_dtype=jnp.bfloat16):
    """Pure-JAX reference with the kernel's precision policy (bf16 operands on
    the matmul, f32 accumulation + bias + ReLU, bf16 intermediates)."""
    n_layers = len(params) // 2
    h = x.astype(weight_dtype)
    for i in range(n_layers):
        w = params[2 * i].astype(weight_dtype)
        b = params[2 * i + 1].reshape(1, -1).astype(jnp.float32)
        acc = jnp.dot(h, w, preferred_element_type=jnp.float32) + b
        if relu_flags[i]:
            acc = jnp.maximum(acc, 0.0)
        h = acc.astype(weight_dtype) if i + 1 < n_layers else acc
    return h


if __name__ == "__main__":
    input_size = 32
    latent_size = 16
    layer_num = 2
    layer_size = 32
    batch = 8

    key = jax.random.PRNGKey(0)
    key, kx = jax.random.split(key)
    x = jax.random.normal(kx, (batch, input_size), jnp.float32)

    params, relu_flags = init_autoencoder_params(
        key, input_size, latent_size, layer_num, layer_size)

    # Padding / casting / bias packing done ONCE at init.
    prepared = prepare_autoencoder_params(params, relu_flags)

    out = functional_autoencoder_forward(x, prepared)
    out = jax.block_until_ready(out)

    ref = reference_forward(x, params, relu_flags)
    assert out.shape == (batch, input_size)
    assert bool(jnp.allclose(out, ref, atol=2e-2, rtol=2e-2)), \
        "mismatch vs JAX reference"

    print("KERNEL_OK")
</pallas_src>

<mosaic_0001>
module attributes {stable_mosaic.version = 11 : i64} {
  func.func @_autoencoder_kernel(%arg0: i32, %arg1: memref<8x128xbf16, #tpu.memory_space<vmem>>, %arg2: memref<8x128xf32, #tpu.memory_space<vmem>>, %arg3: memref<128x128xbf16, #tpu.memory_space<vmem>>, %arg4: memref<128x128xbf16, #tpu.memory_space<vmem>>, %arg5: memref<128x128xbf16, #tpu.memory_space<vmem>>, %arg6: memref<128x128xbf16, #tpu.memory_space<vmem>>, %arg7: memref<128x128xbf16, #tpu.memory_space<vmem>>, %arg8: memref<128x128xbf16, #tpu.memory_space<vmem>>, %arg9: memref<128x128xbf16, #tpu.memory_space<vmem>>, %arg10: memref<128x128xbf16, #tpu.memory_space<vmem>>, %arg11: memref<8x128xf32, #tpu.memory_space<vmem>>) attributes {dimension_semantics = [#tpu.dimension_semantics<parallel>], iteration_bounds = array<i64: 1>, scalar_prefetch = 0 : i64, scratch_operands = 0 : i64, tpu.core_type = #tpu.core_type<tc>, window_params = [{transform_indices = @transform_0, window_bounds = array<i64: 8, 128>}, {pipeline_mode = #tpu.pipeline_mode<synchronous>, transform_indices = @transform_1, window_bounds = array<i64: 8, 128>}, {pipeline_mode = #tpu.pipeline_mode<synchronous>, transform_indices = @transform_2, window_bounds = array<i64: 128, 128>}, {pipeline_mode = #tpu.pipeline_mode<synchronous>, transform_indices = @transform_3, window_bounds = array<i64: 128, 128>}, {pipeline_mode = #tpu.pipeline_mode<synchronous>, transform_indices = @transform_4, window_bounds = array<i64: 128, 128>}, {pipeline_mode = #tpu.pipeline_mode<synchronous>, transform_indices = @transform_5, window_bounds = array<i64: 128, 128>}, {pipeline_mode = #tpu.pipeline_mode<synchronous>, transform_indices = @transform_6, window_bounds = array<i64: 128, 128>}, {pipeline_mode = #tpu.pipeline_mode<synchronous>, transform_indices = @transform_7, window_bounds = array<i64: 128, 128>}, {pipeline_mode = #tpu.pipeline_mode<synchronous>, transform_indices = @transform_8, window_bounds = array<i64: 128, 128>}, {pipeline_mode = #tpu.pipeline_mode<synchronous>, transform_indices = @transform_9, window_bounds = array<i64: 128, 128>}, {transform_indices = @transform_10, window_bounds = array<i64: 8, 128>}]} {
    %c0 = arith.constant 0 : index
    %c0_0 = arith.constant 0 : index
    %0 = vector.load %arg1[%c0, %c0_0] : memref<8x128xbf16, #tpu.memory_space<vmem>>, vector<8x128xbf16>
    %c0_1 = arith.constant 0 : index
    %c0_2 = arith.constant 0 : index
    %1 = vector.load %arg3[%c0_1, %c0_2] : memref<128x128xbf16, #tpu.memory_space<vmem>>, vector<128x128xbf16>
    %cst = arith.constant dense<0.000000e+00> : vector<8x128xf32>
    %2 = tpu.matmul %0, %1, %cst {dimension_numbers = #tpu.dot_dimension_numbers<[1], [0], [0], [1], [0, 0, 1, 1], [], []>} : vector<8x128xbf16>, vector<128x128xbf16>, vector<8x128xf32> -> vector<8x128xf32>
    %c0_3 = arith.constant 0 : index
    %c0_4 = arith.constant 0 : index
    %3 = vector.load %arg2[%c0_3, %c0_4] : memref<8x128xf32, #tpu.memory_space<vmem>>, vector<1x128xf32>
    %4 = vector.broadcast %3 : vector<1x128xf32> to vector<8x128xf32>
    %5 = arith.addf %2, %4 : vector<8x128xf32>
    %cst_5 = arith.constant 0.000000e+00 : f32
    %6 = vector.broadcast %cst_5 : f32 to vector<8x128xf32>
    %7 = arith.maximumf %5, %6 : vector<8x128xf32>
    %8 = arith.truncf %7 : vector<8x128xf32> to vector<8x128xbf16>
    %c0_6 = arith.constant 0 : index
    %c0_7 = arith.constant 0 : index
    %9 = vector.load %arg4[%c0_6, %c0_7] : memref<128x128xbf16, #tpu.memory_space<vmem>>, vector<128x128xbf16>
    %cst_8 = arith.constant dense<0.000000e+00> : vector<8x128xf32>
    %10 = tpu.matmul %8, %9, %cst_8 {dimension_numbers = #tpu.dot_dimension_numbers<[1], [0], [0], [1], [0, 0, 1, 1], [], []>} : vector<8x128xbf16>, vector<128x128xbf16>, vector<8x128xf32> -> vector<8x128xf32>
    %c1 = arith.constant 1 : index
    %c0_9 = arith.constant 0 : index
    %11 = vector.load %arg2[%c1, %c0_9] : memref<8x128xf32, #tpu.memory_space<vmem>>, vector<1x128xf32>
    %12 = vector.broadcast %11 : vector<1x128xf32> to vector<8x128xf32>
    %13 = arith.addf %10, %12 : vector<8x128xf32>
    %cst_10 = arith.constant 0.000000e+00 : f32
    %14 = vector.broadcast %cst_10 : f32 to vector<8x128xf32>
    %15 = arith.maximumf %13, %14 : vector<8x128xf32>
    %16 = arith.truncf %15 : vector<8x128xf32> to vector<8x128xbf16>
    %c0_11 = arith.constant 0 : index
    %c0_12 = arith.constant 0 : index
    %17 = vector.load %arg5[%c0_11, %c0_12] : memref<128x128xbf16, #tpu.memory_space<vmem>>, vector<128x128xbf16>
    %cst_13 = arith.constant dense<0.000000e+00> : vector<8x128xf32>
    %18 = tpu.matmul %16, %17, %cst_13 {dimension_numbers = #tpu.dot_dimension_numbers<[1], [0], [0], [1], [0, 0, 1, 1], [], []>} : vector<8x128xbf16>, vector<128x128xbf16>, vector<8x128xf32> -> vector<8x128xf32>
    %c2 = arith.constant 2 : index
    %c0_14 = arith.constant 0 : index
    %19 = vector.load %arg2[%c2, %c0_14] : memref<8x128xf32, #tpu.memory_space<vmem>>, vector<1x128xf32>
    %20 = vector.broadcast %19 : vector<1x128xf32> to vector<8x128xf32>
    %21 = arith.addf %18, %20 : vector<8x128xf32>
    %cst_15 = arith.constant 0.000000e+00 : f32
    %22 = vector.broadcast %cst_15 : f32 to vector<8x128xf32>
    %23 = arith.maximumf %21, %22 : vector<8x128xf32>
    %24 = arith.truncf %23 : vector<8x128xf32> to vector<8x128xbf16>
    %c0_16 = arith.constant 0 : index
    %c0_17 = arith.constant 0 : index
    %25 = vector.load %arg6[%c0_16, %c0_17] : memref<128x128xbf16, #tpu.memory_space<vmem>>, vector<128x128xbf16>
    %cst_18 = arith.constant dense<0.000000e+00> : vector<8x128xf32>
    %26 = tpu.matmul %24, %25, %cst_18 {dimension_numbers = #tpu.dot_dimension_numbers<[1], [0], [0], [1], [0, 0, 1, 1], [], []>} : vector<8x128xbf16>, vector<128x128xbf16>, vector<8x128xf32> -> vector<8x128xf32>
    %c3 = arith.constant 3 : index
    %c0_19 = arith.constant 0 : index
    %27 = vector.load %arg2[%c3, %c0_19] : memref<8x128xf32, #tpu.memory_space<vmem>>, vector<1x128xf32>
    %28 = vector.broadcast %27 : vector<1x128xf32> to vector<8x128xf32>
    %29 = arith.addf %26, %28 : vector<8x128xf32>
    %30 = arith.truncf %29 : vector<8x128xf32> to vector<8x128xbf16>
    %c0_20 = arith.constant 0 : index
    %c0_21 = arith.constant 0 : index
    %31 = vector.load %arg7[%c0_20, %c0_21] : memref<128x128xbf16, #tpu.memory_space<vmem>>, vector<128x128xbf16>
    %cst_22 = arith.constant dense<0.000000e+00> : vector<8x128xf32>
    %32 = tpu.matmul %30, %31, %cst_22 {dimension_numbers = #tpu.dot_dimension_numbers<[1], [0], [0], [1], [0, 0, 1, 1], [], []>} : vector<8x128xbf16>, vector<128x128xbf16>, vector<8x128xf32> -> vector<8x128xf32>
    %c4 = arith.constant 4 : index
    %c0_23 = arith.constant 0 : index
    %33 = vector.load %arg2[%c4, %c0_23] : memref<8x128xf32, #tpu.memory_space<vmem>>, vector<1x128xf32>
    %34 = vector.broadcast %33 : vector<1x128xf32> to vector<8x128xf32>
    %35 = arith.addf %32, %34 : vector<8x128xf32>
    %cst_24 = arith.constant 0.000000e+00 : f32
    %36 = vector.broadcast %cst_24 : f32 to vector<8x128xf32>
    %37 = arith.maximumf %35, %36 : vector<8x128xf32>
    %38 = arith.truncf %37 : vector<8x128xf32> to vector<8x128xbf16>
    %c0_25 = arith.constant 0 : index
    %c0_26 = arith.constant 0 : index
    %39 = vector.load %arg8[%c0_25, %c0_26] : memref<128x128xbf16, #tpu.memory_space<vmem>>, vector<128x128xbf16>
    %cst_27 = arith.constant dense<0.000000e+00> : vector<8x128xf32>
    %40 = tpu.matmul %38, %39, %cst_27 {dimension_numbers = #tpu.dot_dimension_numbers<[1], [0], [0], [1], [0, 0, 1, 1], [], []>} : vector<8x128xbf16>, vector<128x128xbf16>, vector<8x128xf32> -> vector<8x128xf32>
    %c5 = arith.constant 5 : index
    %c0_28 = arith.constant 0 : index
    %41 = vector.load %arg2[%c5, %c0_28] : memref<8x128xf32, #tpu.memory_space<vmem>>, vector<1x128xf32>
    %42 = vector.broadcast %41 : vector<1x128xf32> to vector<8x128xf32>
    %43 = arith.addf %40, %42 : vector<8x128xf32>
    %cst_29 = arith.constant 0.000000e+00 : f32
    %44 = vector.broadcast %cst_29 : f32 to vector<8x128xf32>
    %45 = arith.maximumf %43, %44 : vector<8x128xf32>
    %46 = arith.truncf %45 : vector<8x128xf32> to vector<8x128xbf16>
    %c0_30 = arith.constant 0 : index
    %c0_31 = arith.constant 0 : index
    %47 = vector.load %arg9[%c0_30, %c0_31] : memref<128x128xbf16, #tpu.memory_space<vmem>>, vector<128x128xbf16>
    %cst_32 = arith.constant dense<0.000000e+00> : vector<8x128xf32>
    %48 = tpu.matmul %46, %47, %cst_32 {dimension_numbers = #tpu.dot_dimension_numbers<[1], [0], [0], [1], [0, 0, 1, 1], [], []>} : vector<8x128xbf16>, vector<128x128xbf16>, vector<8x128xf32> -> vector<8x128xf32>
    %c6 = arith.constant 6 : index
    %c0_33 = arith.constant 0 : index
    %49 = vector.load %arg2[%c6, %c0_33] : memref<8x128xf32, #tpu.memory_space<vmem>>, vector<1x128xf32>
    %50 = vector.broadcast %49 : vector<1x128xf32> to vector<8x128xf32>
    %51 = arith.addf %48, %50 : vector<8x128xf32>
    %cst_34 = arith.constant 0.000000e+00 : f32
    %52 = vector.broadcast %cst_34 : f32 to vector<8x128xf32>
    %53 = arith.maximumf %51, %52 : vector<8x128xf32>
    %54 = arith.truncf %53 : vector<8x128xf32> to vector<8x128xbf16>
    %c0_35 = arith.constant 0 : index
    %c0_36 = arith.constant 0 : index
    %55 = vector.load %arg10[%c0_35, %c0_36] : memref<128x128xbf16, #tpu.memory_space<vmem>>, vector<128x128xbf16>
    %cst_37 = arith.constant dense<0.000000e+00> : vector<8x128xf32>
    %56 = tpu.matmul %54, %55, %cst_37 {dimension_numbers = #tpu.dot_dimension_numbers<[1], [0], [0], [1], [0, 0, 1, 1], [], []>} : vector<8x128xbf16>, vector<128x128xbf16>, vector<8x128xf32> -> vector<8x128xf32>
    %c7 = arith.constant 7 : index
    %c0_38 = arith.constant 0 : index
    %57 = vector.load %arg2[%c7, %c0_38] : memref<8x128xf32, #tpu.memory_space<vmem>>, vector<1x128xf32>
    %58 = vector.broadcast %57 : vector<1x128xf32> to vector<8x128xf32>
    %59 = arith.addf %56, %58 : vector<8x128xf32>
    %c0_39 = arith.constant 0 : index
    %c0_40 = arith.constant 0 : index
    %60 = vector.load %arg11[%c0_39, %c0_40] : memref<8x128xf32, #tpu.memory_space<vmem>>, vector<8x128xf32>
    tpu.vector_store %arg11[%c0_39, %c0_40], %59 {strides = array<i32>} : memref<8x128xf32, #tpu.memory_space<vmem>>, vector<8x128xf32>,
    return
  }
  func.func @transform_0(%arg0: i32) -> (i32, i32) {
    %c0_i32 = arith.constant 0 : i32
    %c0_i32_0 = arith.constant 0 : i32
    return %arg0, %c0_i32 : i32, i32
  }
  func.func @transform_1(%arg0: i32) -> (i32, i32) {
    %c0_i32 = arith.constant 0 : i32
    %c0_i32_0 = arith.constant 0 : i32
    %c0_i32_1 = arith.constant 0 : i32
    return %c0_i32, %c0_i32_0 : i32, i32
  }
  func.func @transform_2(%arg0: i32) -> (i32, i32) {
    %c0_i32 = arith.constant 0 : i32
    %c0_i32_0 = arith.constant 0 : i32
    %c0_i32_1 = arith.constant 0 : i32
    return %c0_i32, %c0_i32_0 : i32, i32
  }
  func.func @transform_3(%arg0: i32) -> (i32, i32) {
    %c0_i32 = arith.constant 0 : i32
    %c0_i32_0 = arith.constant 0 : i32
    %c0_i32_1 = arith.constant 0 : i32
    return %c0_i32, %c0_i32_0 : i32, i32
  }
  func.func @transform_4(%arg0: i32) -> (i32, i32) {
    %c0_i32 = arith.constant 0 : i32
    %c0_i32_0 = arith.constant 0 : i32
    %c0_i32_1 = arith.constant 0 : i32
    return %c0_i32, %c0_i32_0 : i32, i32
  }
  func.func @transform_5(%arg0: i32) -> (i32, i32) {
    %c0_i32 = arith.constant 0 : i32
    %c0_i32_0 = arith.constant 0 : i32
    %c0_i32_1 = arith.constant 0 : i32
    return %c0_i32, %c0_i32_0 : i32, i32
  }
  func.func @transform_6(%arg0: i32) -> (i32, i32) {
    %c0_i32 = arith.constant 0 : i32
    %c0_i32_0 = arith.constant 0 : i32
    %c0_i32_1 = arith.constant 0 : i32
    return %c0_i32, %c0_i32_0 : i32, i32
  }
  func.func @transform_7(%arg0: i32) -> (i32, i32) {
    %c0_i32 = arith.constant 0 : i32
    %c0_i32_0 = arith.constant 0 : i32
    %c0_i32_1 = arith.constant 0 : i32
    return %c0_i32, %c0_i32_0 : i32, i32
  }
  func.func @transform_8(%arg0: i32) -> (i32, i32) {
    %c0_i32 = arith.constant 0 : i32
    %c0_i32_0 = arith.constant 0 : i32
    %c0_i32_1 = arith.constant 0 : i32
    return %c0_i32, %c0_i32_0 : i32, i32
  }
  func.func @transform_9(%arg0: i32) -> (i32, i32) {
    %c0_i32 = arith.constant 0 : i32
    %c0_i32_0 = arith.constant 0 : i32
    %c0_i32_1 = arith.constant 0 : i32
    return %c0_i32, %c0_i32_0 : i32, i32
  }
  func.func @transform_10(%arg0: i32) -> (i32, i32) {
    %c0_i32 = arith.constant 0 : i32
    %c0_i32_0 = arith.constant 0 : i32
    return %arg0, %c0_i32 : i32, i32
  }
}

</mosaic_0001>

<bundles_post_ra>
// kernel: tpu_custom_call.1
= control target key start
LH: loop header
LB: loop body
LE: loop exit
PB: predicated region body
PF: predicated region fallthrough
CT: control target
= control target key end

     0   :  { %15 = vsyncpa [#allocation3], 0  ;;  %s2021_s0 = inlined_call_operand.hbm [shape: bf16[8,128], index: 0, kind: input, shape index: {}]   ;;  %s2022_s1 = inlined_call_operand.hbm [shape: f32[8,128], index: 1, kind: input, shape index: {}]   ;;  %s2023_s2 = inlined_call_operand.hbm [shape: bf16[128,128], index: 2, kind: input, shape index: {}]   ;;  %s2024_s3 = inlined_call_operand.hbm [shape: bf16[128,128], index: 3, kind: input, shape index: {}]   ;;  %s2025_s4 = inlined_call_operand.hbm [shape: bf16[128,128], index: 4, kind: input, shape index: {}]   ;;  %s2026_s5 = inlined_call_operand.hbm [shape: bf16[128,128], index: 5, kind: input, shape index: {}]   ;;  %s2027_s6 = inlined_call_operand.hbm [shape: bf16[128,128], index: 6, kind: input, shape index: {}]   ;;  %s2028_s7 = inlined_call_operand.hbm [shape: bf16[128,128], index: 7, kind: input, shape index: {}]   ;;  %s2029_s8 = inlined_call_operand.hbm [shape: bf16[128,128], index: 8, kind: input, shape index: {}]   ;;  %s2030_s9 = inlined_call_operand.hbm [shape: bf16[128,128], index: 9, kind: input, shape index: {}]   ;;  %s2031_s10 = inlined_call_operand.hbm [shape: f32[8,128], index: 10, kind: output, shape index: {}]  }
   0x1   :  { %16 = vsyncpa [#allocation6], 0 }
   0x2   :  { %17 = vsyncpa [#allocation9], 0 }
   0x3   :  { %18 = vsyncpa [#allocation12], 0 }
   0x4   :  { %19 = vsyncpa [#allocation15], 0 }
   0x5   :  { %20 = vsyncpa [#allocation18], 0 }
   0x6   :  { %21 = vsyncpa [#allocation4], 0  ;;  %s1715_s13 = smov [#allocation5]   ;;  %s1459_s17 = scalar_lea.hbm %s2022_s1, 128 }
   0x7   :  { %s38_s14 = sshll.u32 %s1715_s13, 4  ;;  %p1460_p0 = scmp.ne.s32.totalorder %s2022_s1, %s1459_s17  ;;  %s39_s14 = int_to_ptr.vmem [resolvable:$true] %s38_s14 }
   0x8   :  { %p1463_p1 = scmp.lt.u32.totalorder %s1459_s17, %s2022_s1 }
   0xa   :  { %p1465_p2 = pnand %p1463_p1, %p1460_p0 }
   0xc   :  { %1468 = shalt.err (!%p1465_p2)
}
   0xd   :  { %s1469_s22 = scalar_lea.vmem %s39_s14, 128  ;;  %p1474_p4 = scmp.lt.s32.totalorder %s39_s14, %s39_s14 }
   0xe   :  { %p1470_p3 = scmp.ne.s32.totalorder %s39_s14, %s1469_s22  ;;  %p1475_p5 = scmp.lt.s32.totalorder %s1469_s22, %s1469_s22 }
  0x10   :  { %p1476_p6 = por %p1475_p5, %p1474_p4 }
  0x12   :  { %p1477_p7 = pnand %p1476_p6, %p1470_p3 }
  0x14   :  { %1480 = shalt.err (!%p1477_p7)
}
  0x15   :  { %41 = dma.hbm_to_vmem [thread:$0]  %s2022_s1, 128, %s39_s14, [#allocation6]  }
  0x16   :  { %s1716_s25 = smov [#allocation8]   ;;  %s1717_s27 = smov [#allocation11]  }
  0x17   :  { %s59_s26 = sshll.u32 %s1716_s25, 4  ;;  %s83_s28 = sshll.u32 %s1717_s27, 4  ;;  %s60_s26 = int_to_ptr.vmem [resolvable:$true] %s59_s26  ;;  %s84_s28 = int_to_ptr.vmem [resolvable:$true] %s83_s28 }
  0x18   :  { %s1481_s11 = scalar_lea.hbm %s2024_s3, 1024 }
  0x19   :  { %p1482_p8 = scmp.ne.s32.totalorder %s2024_s3, %s1481_s11  ;;  %p1485_p9 = scmp.lt.u32.totalorder %s1481_s11, %s2024_s3 }
  0x1b   :  { %p1487_p10 = pnand %p1485_p9, %p1482_p8 }
  0x1d   :  { %1490 = shalt.err (!%p1487_p10)
}
  0x1e   :  { %s1491_s1 = scalar_lea.vmem %s60_s26, 1024  ;;  %p1496_p12 = scmp.lt.s32.totalorder %s60_s26, %s60_s26 }
  0x1f   :  { %p1492_p11 = scmp.ne.s32.totalorder %s60_s26, %s1491_s1  ;;  %p1497_p13 = scmp.lt.s32.totalorder %s1491_s1, %s1491_s1 }
  0x21   :  { %p1498_p0 = por %p1497_p13, %p1496_p12 }
  0x23   :  { %p1499_p1 = pnand %p1498_p0, %p1492_p11 }
  0x25   :  { %1502 = shalt.err (!%p1499_p1)
}
  0x26   :  { %s1718_s14 = smov 64   ;;  %s1719_s17 = smov 4  }
  0x27   :  { %65 = dma.hbm_to_vmem [thread:$0]  %s2024_s3, 1024, %s60_s26, [#allocation9], %s1718_s14, %s1718_s14, %s1719_s17  }
  0x28   :  { %s1503_s22 = scalar_lea.hbm %s2026_s5, 1024 }
  0x29   :  { %p1504_p2 = scmp.ne.s32.totalorder %s2026_s5, %s1503_s22  ;;  %p1507_p3 = scmp.lt.u32.totalorder %s1503_s22, %s2026_s5 }
  0x2b   :  { %p1509_p4 = pnand %p1507_p3, %p1504_p2 }
  0x2d   :  { %1512 = shalt.err (!%p1509_p4)
}
  0x2e   :  { %s1513_s29 = scalar_lea.vmem %s84_s28, 1024  ;;  %p1518_p6 = scmp.lt.s32.totalorder %s84_s28, %s84_s28 }
  0x2f   :  { %p1514_p5 = scmp.ne.s32.totalorder %s84_s28, %s1513_s29  ;;  %p1519_p7 = scmp.lt.s32.totalorder %s1513_s29, %s1513_s29 }
  0x31   :  { %p1520_p8 = por %p1519_p7, %p1518_p6 }
  0x33   :  { %p1521_p9 = pnand %p1520_p8, %p1514_p5 }
  0x35   :  { %1524 = shalt.err (!%p1521_p9)
}
  0x36   :  { %89 = dma.hbm_to_vmem [thread:$0]  %s2026_s5, 1024, %s84_s28, [#allocation12], %s1718_s14, %s1718_s14, %s1719_s17  }
  0x37   :  { %s1720_s30 = smov [#allocation14]   ;;  %s1721_s12 = smov [#allocation2]  }
  0x38   :  { %s107_s11 = sshll.u32 %s1720_s30, 4  ;;  %s28_s13 = sshll.u32 %s1721_s12, 4  ;;  %s108_s11 = int_to_ptr.vmem [resolvable:$true] %s107_s11  ;;  %s29_s13 = int_to_ptr.vmem [resolvable:$true] %s28_s13 }
  0x39   :  { %s1525_s1 = scalar_lea.hbm %s2028_s7, 1024 }
  0x3a   :  { %p1526_p10 = scmp.ne.s32.totalorder %s2028_s7, %s1525_s1  ;;  %p1529_p11 = scmp.lt.u32.totalorder %s1525_s1, %s2028_s7 }
  0x3c   :  { %p1531_p12 = pnand %p1529_p11, %p1526_p10 }
  0x3e   :  { %1534 = shalt.err (!%p1531_p12)
}
  0x3f   :  { %s1535_s5 = scalar_lea.vmem %s108_s11, 1024  ;;  %p1540_p0 = scmp.lt.s32.totalorder %s108_s11, %s108_s11 }
  0x40   :  { %p1536_p13 = scmp.ne.s32.totalorder %s108_s11, %s1535_s5  ;;  %p1541_p1 = scmp.lt.s32.totalorder %s1535_s5, %s1535_s5 }
  0x42   :  { %p1542_p2 = por %p1541_p1, %p1540_p0 }
  0x44   :  { %p1543_p3 = pnand %p1542_p2, %p1536_p13 }
  0x46   :  { %1546 = shalt.err (!%p1543_p3)
}
  0x47   :  { %113 = dma.hbm_to_vmem [thread:$0]  %s2028_s7, 1024, %s108_s11, [#allocation15], %s1718_s14, %s1718_s14, %s1719_s17  }
  0x48   :  { %s1547_s25 = scalar_lea.hbm %s2021_s0, 64 }
  0x49   :  { %p1548_p4 = scmp.ne.s32.totalorder %s2021_s0, %s1547_s25  ;;  %p1551_p5 = scmp.lt.u32.totalorder %s1547_s25, %s2021_s0 }
  0x4b   :  { %p1553_p6 = pnand %p1551_p5, %p1548_p4 }
  0x4d   :  { %1556 = shalt.err (!%p1553_p6)
}
  0x4e   :  { %s1557_s30 = scalar_lea.vmem %s29_s13, 64  ;;  %p1562_p8 = scmp.lt.s32.totalorder %s29_s13, %s29_s13 }
  0x4f   :  { %p1558_p7 = scmp.ne.s32.totalorder %s29_s13, %s1557_s30  ;;  %p1563_p9 = scmp.lt.s32.totalorder %s1557_s30, %s1557_s30 }
  0x51   :  { %p1564_p10 = por %p1563_p9, %p1562_p8 }
  0x53   :  { %p1565_p11 = pnand %p1564_p10, %p1558_p7 }
  0x55   :  { %1568 = shalt.err (!%p1565_p11)
}
  0x56   :  { %31 = dma.hbm_to_vmem [thread:$0]  %s2021_s0, 64, %s29_s13, [#allocation3]  }
  0x57   :  { %s1722_s12 = smov [#allocation7]   ;;  %s1723_s16 = smov [#allocation10]  }
  0x58   :  { %s47_s15 = sshll.u32 %s1722_s12, 4  ;;  %s71_s1 = sshll.u32 %s1723_s16, 4  ;;  %s48_s15 = int_to_ptr.vmem [resolvable:$true] %s47_s15  ;;  %s72_s1 = int_to_ptr.vmem [resolvable:$true] %s71_s1 }
  0x59   :  { %s1569_s20 = scalar_lea.hbm %s2023_s2, 1024 }
  0x5a   :  { %p1570_p12 = scmp.ne.s32.totalorder %s2023_s2, %s1569_s20  ;;  %p1573_p13 = scmp.lt.u32.totalorder %s1569_s20, %s2023_s2 }
  0x5c   :  { %p1575_p0 = pnand %p1573_p13, %p1570_p12 }
  0x5e   :  { %1578 = shalt.err (!%p1575_p0)
}
  0x5f   :  { %s1579_s0 = scalar_lea.vmem %s48_s15, 1024  ;;  %p1584_p2 = scmp.lt.s32.totalorder %s48_s15, %s48_s15 }
  0x60   :  { %p1580_p1 = scmp.ne.s32.totalorder %s48_s15, %s1579_s0  ;;  %p1585_p3 = scmp.lt.s32.totalorder %s1579_s0, %s1579_s0 }
  0x62   :  { %p1586_p4 = por %p1585_p3, %p1584_p2 }
  0x64   :  { %p1587_p5 = pnand %p1586_p4, %p1580_p1 }
  0x66   :  { %1590 = shalt.err (!%p1587_p5)
}
  0x67   :  { %53 = dma.hbm_to_vmem [thread:$0]  %s2023_s2, 1024, %s48_s15, [#allocation6], %s1718_s14, %s1718_s14, %s1719_s17  }
  0x68   :  { %s1591_s27 = scalar_lea.hbm %s2025_s4, 1024 }
  0x69   :  { %p1592_p6 = scmp.ne.s32.totalorder %s2025_s4, %s1591_s27  ;;  %p1595_p7 = scmp.lt.u32.totalorder %s1591_s27, %s2025_s4 }
  0x6b   :  { %p1597_p8 = pnand %p1595_p7, %p1592_p6 }
  0x6d   :  { %1600 = shalt.err (!%p1597_p8)
}
  0x6e   :  { %s1601_s7 = scalar_lea.vmem %s72_s1, 1024  ;;  %p1606_p10 = scmp.lt.s32.totalorder %s72_s1, %s72_s1 }
  0x6f   :  { %p1602_p9 = scmp.ne.s32.totalorder %s72_s1, %s1601_s7  ;;  %p1607_p11 = scmp.lt.s32.totalorder %s1601_s7, %s1601_s7 }
  0x71   :  { %p1608_p12 = por %p1607_p11, %p1606_p10 }
  0x73   :  { %p1609_p13 = pnand %p1608_p12, %p1602_p9 }
  0x75   :  { %1612 = shalt.err (!%p1609_p13)
}
  0x76   :  { %77 = dma.hbm_to_vmem [thread:$0]  %s2025_s4, 1024, %s72_s1, [#allocation9], %s1718_s14, %s1718_s14, %s1719_s17  }
  0x77   :  { %s1724_s12 = smov [#allocation13]   ;;  %s1725_s16 = smov [#allocation16]  }
  0x78   :  { %s95_s15 = sshll.u32 %s1724_s12, 4  ;;  %s119_s18 = sshll.u32 %s1725_s16, 4  ;;  %s96_s15 = int_to_ptr.vmem [resolvable:$true] %s95_s15  ;;  %s120_s18 = int_to_ptr.vmem [resolvable:$true] %s119_s18 }
  0x79   :  { %s1613_s21 = scalar_lea.hbm %s2027_s6, 1024 }
  0x7a   :  { %p1614_p0 = scmp.ne.s32.totalorder %s2027_s6, %s1613_s21  ;;  %p1617_p1 = scmp.lt.u32.totalorder %s1613_s21, %s2027_s6 }
  0x7c   :  { %p1619_p2 = pnand %p1617_p1, %p1614_p0 }
  0x7e   :  { %1622 = shalt.err (!%p1619_p2)
}
  0x7f   :  { %s1623_s4 = scalar_lea.vmem %s96_s15, 1024  ;;  %p1628_p4 = scmp.lt.s32.totalorder %s96_s15, %s96_s15 }
  0x80   :  { %p1624_p3 = scmp.ne.s32.totalorder %s96_s15, %s1623_s4  ;;  %p1629_p5 = scmp.lt.s32.totalorder %s1623_s4, %s1623_s4 }
  0x82   :  { %p1630_p6 = por %p1629_p5, %p1628_p4 }
  0x84   :  { %p1631_p7 = pnand %p1630_p6, %p1624_p3 }
  0x86   :  { %1634 = shalt.err (!%p1631_p7)
}
  0x87   :  { %101 = dma.hbm_to_vmem [thread:$0]  %s2027_s6, 1024, %s96_s15, [#allocation12], %s1718_s14, %s1718_s14, %s1719_s17  }
  0x88   :  { %s1635_s25 = scalar_lea.hbm %s2029_s8, 1024 }
  0x89   :  { %p1636_p8 = scmp.ne.s32.totalorder %s2029_s8, %s1635_s25  ;;  %p1639_p9 = scmp.lt.u32.totalorder %s1635_s25, %s2029_s8 }
  0x8b   :  { %p1641_p10 = pnand %p1639_p9, %p1636_p8 }
  0x8d   :  { %1644 = shalt.err (!%p1641_p10)
}
  0x8e   :  { %s1645_s30 = scalar_lea.vmem %s120_s18, 1024  ;;  %p1650_p12 = scmp.lt.s32.totalorder %s120_s18, %s120_s18 }
  0x8f   :  { %p1646_p11 = scmp.ne.s32.totalorder %s120_s18, %s1645_s30  ;;  %p1651_p13 = scmp.lt.s32.totalorder %s1645_s30, %s1645_s30 }
  0x91   :  { %p1652_p0 = por %p1651_p13, %p1650_p12 }
  0x93   :  { %p1653_p1 = pnand %p1652_p0, %p1646_p11 }
  0x95   :  { %1656 = shalt.err (!%p1653_p1)
}
  0x96   :  { %125 = dma.hbm_to_vmem [thread:$0]  %s2029_s8, 1024, %s120_s18, [#allocation15], %s1718_s14, %s1718_s14, %s1719_s17  }
  0x97   :  { %s1726_s2 = smov [#allocation17]   ;;  %s1657_s16 = scalar_lea.hbm %s2030_s9, 1024 }
  0x98   :  { %s131_s11 = sshll.u32 %s1726_s2, 4  ;;  %p1658_p2 = scmp.ne.s32.totalorder %s2030_s9, %s1657_s16  ;;  %s132_s11 = int_to_ptr.vmem [resolvable:$true] %s131_s11 }
  0x99   :  { %p1661_p3 = scmp.lt.u32.totalorder %s1657_s16, %s2030_s9 }
  0x9b   :  { %p1663_p4 = pnand %p1661_p3, %p1658_p2 }
  0x9d   :  { %1666 = shalt.err (!%p1663_p4)
}
  0x9e   :  { %s1667_s28 = scalar_lea.vmem %s132_s11, 1024  ;;  %p1672_p6 = scmp.lt.s32.totalorder %s132_s11, %s132_s11 }
  0x9f   :  { %p1668_p5 = scmp.ne.s32.totalorder %s132_s11, %s1667_s28  ;;  %p1673_p7 = scmp.lt.s32.totalorder %s1667_s28, %s1667_s28 }
  0xa1   :  { %p1674_p8 = por %p1673_p7, %p1672_p6 }
  0xa3   :  { %p1675_p9 = pnand %p1674_p8, %p1668_p5 }
  0xa5   :  { %1678 = shalt.err (!%p1675_p9)
}
  0xa6   :  { %137 = dma.hbm_to_vmem [thread:$0]  %s2030_s9, 1024, %s132_s11, [#allocation18], %s1718_s14, %s1718_s14, %s1719_s17  }
  0xa7   :  { %1701 = dma.done.wait [#allocation3], 64  }
  0xa8   :  { %1702 = vsyncadd [#allocation3], 4294967232 }
  0xa9   :  { %1703 = dma.done.wait [#allocation6], 1152  }
  0xaa   :  { %1704 = vsyncadd [#allocation6], 4294966144 }
  0xab   :  { %1705 = dma.done.wait [#allocation9], 2048  }
  0xac   :  { %1706 = vsyncadd [#allocation9], 4294965248 }
  0xad   :  { %1707 = dma.done.wait [#allocation12], 2048  }
  0xae   :  { %1708 = vsyncadd [#allocation12], 4294965248 }
  0xaf   :  { %1709 = dma.done.wait [#allocation15], 2048  }
  0xb0   :  { %1710 = vsyncadd [#allocation15], 4294965248 }
  0xb1   :  { %1711 = dma.done.wait [#allocation18], 1024  }
  0xb2   :  { %1712 = vsyncadd [#allocation18], 4294966272  ;;  %v1727_v0 = vmov 0.0   ;;  %vm1728_vm0 = vmmov 0   ;;  %v1395_v1 = vld [vmem:[#allocation7] sm:$0xff]   ;;  %v1396_v2 = vld [vmem:[#allocation7 + $0x8] sm:$0xff]  }
  0xb3   :  { %1220 = vmatprep.subr.bf16.mxu0 %v1727_v0  ;;  %1236 = vmatprep.mubr.msk.bf16.mxu0 %vm1728_vm0, %v1727_v0  ;;  %v1397_v3 = vld [vmem:[#allocation7 + $0x10] sm:$0xff]   ;;  %v1403_v4 = vld [vmem:[#allocation8] sm:$0xff]   ;;  %v1398_v5 = vld [vmem:[#allocation7 + $0x18] sm:$0xff]   ;;  %s1729_s9 = smov [#allocation19]  }
  0xb4   :  { %1240 = vmatprep.subr.bf16.mxu1 %v1727_v0  ;;  %1256 = vmatprep.mubr.msk.bf16.mxu1 %vm1728_vm0, %v1727_v0  ;;  %v1404_v6 = vld [vmem:[#allocation8 + $0x8] sm:$0xff]   ;;  %v1399_v7 = vld [vmem:[#allocation7 + $0x20] sm:$0xff]   ;;  %v1405_v8 = vld [vmem:[#allocation8 + $0x10] sm:$0xff]   ;;  %s1062_s14 = sshll.u32 %s1729_s9, 4  ;;  %s1063_s14 = int_to_ptr.vmem [resolvable:$true] %s1062_s14 }
  0xb5   :  { %1221 = vmatpush3.bf16.msra.mxu0 %v1395_v1  ;;  %1241 = vmatpush3.bf16.msra.mxu1 %v1403_v4  ;;  %v1400_v9 = vld [vmem:[#allocation7 + $0x28] sm:$0xff]   ;;  %v1406_v10 = vld [vmem:[#allocation8 + $0x18] sm:$0xff]   ;;  %v1401_v11 = vld [vmem:[#allocation7 + $0x30] sm:$0xff]   ;;  %s1679_s17 = scalar_lea.vmem %s1063_s14, 128  ;;  %p1684_p11 = scmp.lt.s32.totalorder %s1063_s14, %s1063_s14 }
  0xb6   :  { %1222 = vmatprep.subr.bf16.mxu0 %v1727_v0  ;;  %1242 = vmatprep.subr.bf16.mxu1 %v1727_v0  ;;  %v1407_v12 = vld [vmem:[#allocation8 + $0x20] sm:$0xff]   ;;  %v1402_v13 = vld [vmem:[#allocation7 + $0x38] sm:$0xff]   ;;  %v1408_v14 = vld [vmem:[#allocation8 + $0x28] sm:$0xff]   ;;  %p1680_p10 = scmp.ne.s32.totalorder %s1063_s14, %s1679_s17  ;;  %p1685_p12 = scmp.lt.s32.totalorder %s1679_s17, %s1679_s17 }
  0xb7   :  { %v169_v15 = vld [vmem:[#allocation2] sm:$0xf]  ;;  %v1410_v17 = vld [vmem:[#allocation8 + $0x38] sm:$0xff]   ;;  %v1411_v18 = vld [vmem:[#allocation10] sm:$0xff]  }
  0xb8   :  { %v1409_v16 = vld [vmem:[#allocation8 + $0x30] sm:$0xff]   ;;  %v1412_v19 = vld [vmem:[#allocation10 + $0x8] sm:$0xff]   ;;  %v1414_v21 = vld [vmem:[#allocation10 + $0x18] sm:$0xff]   ;;  %p1686_p13 = por %p1685_p12, %p1684_p11 }
  0xb9   :  { %1223 = vmatpush3.bf16.msra.mxu0 %v1396_v2  ;;  %1243 = vmatpush3.bf16.msra.mxu1 %v1404_v6  ;;  %v1413_v20 = vld [vmem:[#allocation10 + $0x10] sm:$0xff]   ;;  %v1415_v22 = vld [vmem:[#allocation10 + $0x20] sm:$0xff]   ;;  %v1416_v23 = vld [vmem:[#allocation10 + $0x28] sm:$0xff]  }
  0xba   :  { %1224 = vmatprep.subr.bf16.mxu0 %v1727_v0  ;;  %1244 = vmatprep.subr.bf16.mxu1 %v1727_v0  ;;  %v1076_v24 = vld [vmem:[#allocation5] ss:$0 sm:$0xff]  ;;  %v1417_v32 = vld [vmem:[#allocation10 + $0x30] sm:$0xff]   ;;  %v1419_v34 = vld [vmem:[#allocation11] sm:$0xff]   ;;  %p1687_p0 = pnand %p1686_p13, %p1680_p10 }
  0xbb   :  { %v1418_v33 = vld [vmem:[#allocation10 + $0x38] sm:$0xff]   ;;  %v1420_v35 = vld [vmem:[#allocation11 + $0x8] sm:$0xff]   ;;  %v1421_v36 = vld [vmem:[#allocation11 + $0x10] sm:$0xff]  }
  0xbc   :  { %v1422_v37 = vld [vmem:[#allocation11 + $0x18] sm:$0xff]   ;;  %v1423_v38 = vld [vmem:[#allocation11 + $0x20] sm:$0xff]   ;;  %v1424_v39 = vld [vmem:[#allocation11 + $0x28] sm:$0xff]  }
  0xbd   :  { %1225 = vmatpush3.bf16.msra.mxu0 %v1397_v3  ;;  %1245 = vmatpush3.bf16.msra.mxu1 %v1405_v8  ;;  %v1085_v40 = vld [vmem:[#allocation5 + $0x1] ss:$0 sm:$0xff]  ;;  %v1425_v48 = vld [vmem:[#allocation11 + $0x30] sm:$0xff]   ;;  %v1427_v50 = vld [vmem:[#allocation13] sm:$0xff]  }
  0xbe   :  { %1226 = vmatprep.subr.bf16.mxu0 %v1727_v0  ;;  %1246 = vmatprep.subr.bf16.mxu1 %v1727_v0  ;;  %v1426_v49 = vld [vmem:[#allocation11 + $0x38] sm:$0xff]   ;;  %v1428_v51 = vld [vmem:[#allocation13 + $0x8] sm:$0xff]   ;;  %v1429_v52 = vld [vmem:[#allocation13 + $0x10] sm:$0xff]  }
  0xbf   :  { %v1430_v53 = vld [vmem:[#allocation13 + $0x18] sm:$0xff]   ;;  %v1431_v54 = vld [vmem:[#allocation13 + $0x20] sm:$0xff]   ;;  %v1432_v55 = vld [vmem:[#allocation13 + $0x28] sm:$0xff]  }
  0xc0   :  { %v1433_v56 = vld [vmem:[#allocation13 + $0x30] sm:$0xff]   ;;  %v1094_v57 = vld [vmem:[#allocation5 + $0x2] ss:$0 sm:$0xff]  ;;  %v1435_v3 = vld [vmem:[#allocation14] sm:$0xff]  }
  0xc1   :  { %1227 = vmatpush3.bf16.msra.mxu0 %v1398_v5  ;;  %1247 = vmatpush3.bf16.msra.mxu1 %v1406_v10  ;;  %v1434_v2 = vld [vmem:[#allocation13 + $0x38] sm:$0xff]   ;;  %v1436_v4 = vld [vmem:[#allocation14 + $0x8] sm:$0xff]   ;;  %v1437_v5 = vld [vmem:[#allocation14 + $0x10] sm:$0xff]  }
  0xc2   :  { %1228 = vmatprep.subr.bf16.mxu0 %v1727_v0  ;;  %1248 = vmatprep.subr.bf16.mxu1 %v1727_v0  ;;  %v1438_v6 = vld [vmem:[#allocation14 + $0x18] sm:$0xff]   ;;  %v1440_v8 = vld [vmem:[#allocation14 + $0x28] sm:$0xff]  }
  0xc5   :  { %1229 = vmatpush3.bf16.msra.mxu0 %v1399_v7  ;;  %1249 = vmatpush3.bf16.msra.mxu1 %v1407_v12  ;;  %v1439_v7 = vld [vmem:[#allocation14 + $0x20] sm:$0xff]  }
  0xc6   :  { %1230 = vmatprep.subr.bf16.mxu0 %v1727_v0  ;;  %1250 = vmatprep.subr.bf16.mxu1 %v1727_v0 }
  0xc9   :  { %1231 = vmatpush3.bf16.msra.mxu0 %v1400_v9  ;;  %1251 = vmatpush3.bf16.msra.mxu1 %v1408_v14  ;;  %v1103_v9 = vld [vmem:[#allocation5 + $0x3] ss:$0 sm:$0xff] }
  0xca   :  { %1232 = vmatprep.subr.bf16.mxu0 %v1727_v0  ;;  %1252 = vmatprep.subr.bf16.mxu1 %v1727_v0 }
  0xcd   :  { %1233 = vmatpush3.bf16.msra.mxu0 %v1401_v11  ;;  %1253 = vmatpush3.bf16.msra.mxu1 %v1409_v16  ;;  %v1441_v16 = vld [vmem:[#allocation14 + $0x30] sm:$0xff]  }
  0xce   :  { %1234 = vmatprep.subr.bf16.mxu0 %v1727_v0  ;;  %1254 = vmatprep.subr.bf16.mxu1 %v1727_v0 }
  0xd1   :  { %1235 = vmatpush3.bf16.msra.mxu0 %v1402_v13  ;;  %1255 = vmatpush3.bf16.msra.mxu1 %v1410_v17  ;;  %v1442_v17 = vld [vmem:[#allocation14 + $0x38] sm:$0xff]  }
  0xd2   :  { %1260 = vmatprep.subr.bf16.mxu0 %v1727_v0  ;;  %1280 = vmatprep.subr.bf16.mxu1 %v1727_v0 }
  0xd4   :  { %1237 = vmatmul.mubr.bf16.vlgmr.msra.gmra.mrb[0].mxu0 %v169_v15 }
  0xd5   :  { %1276 = vmatprep.mubr.msk.bf16.mxu0 %vm1728_vm0, %v1727_v0  ;;  %1261 = vmatpush3.bf16.msra.mxu0 %v1411_v18  ;;  %v1443_v18 = vld [vmem:[#allocation16] sm:$0xff]  }
  0xd6   :  { %1262 = vmatprep.subr.bf16.mxu0 %v1727_v0 }
  0xd9   :  { %1263 = vmatpush3.bf16.msra.mxu0 %v1412_v19  ;;  %v1444_v19 = vld [vmem:[#allocation16 + $0x8] sm:$0xff]  }
  0xda   :  { %1264 = vmatprep.subr.bf16.mxu0 %v1727_v0 }
  0xdd   :  { %1265 = vmatpush3.bf16.msra.mxu0 %v1413_v20  ;;  %v1445_v20 = vld [vmem:[#allocation16 + $0x10] sm:$0xff]  }
  0xde   :  { %1266 = vmatprep.subr.bf16.mxu0 %v1727_v0 }
  0xe1   :  { %1267 = vmatpush3.bf16.msra.mxu0 %v1414_v21  ;;  %v1446_v21 = vld [vmem:[#allocation16 + $0x18] sm:$0xff]  }
  0xe2   :  { %1268 = vmatprep.subr.bf16.mxu0 %v1727_v0 }
  0xe5   :  { %1269 = vmatpush3.bf16.msra.mxu0 %v1415_v22  ;;  %v1447_v22 = vld [vmem:[#allocation16 + $0x20] sm:$0xff]  }
  0xe6   :  { %1270 = vmatprep.subr.bf16.mxu0 %v1727_v0 }
  0xe9   :  { %1271 = vmatpush3.bf16.msra.mxu0 %v1416_v23  ;;  %v1448_v23 = vld [vmem:[#allocation16 + $0x28] sm:$0xff]  }
  0xea   :  { %1272 = vmatprep.subr.bf16.mxu0 %v1727_v0 }
  0xed   :  { %1273 = vmatpush3.bf16.msra.mxu0 %v1417_v32  ;;  %v1449_v32 = vld [vmem:[#allocation16 + $0x30] sm:$0xff]  }
  0xee   :  { %1274 = vmatprep.subr.bf16.mxu0 %v1727_v0 }
  0xf1   :  { %1275 = vmatpush3.bf16.msra.mxu0 %v1418_v33  ;;  %v1450_v33 = vld [vmem:[#allocation16 + $0x38] sm:$0xff]  }
  0xf2   :  { %1300 = vmatprep.subr.bf16.mxu0 %v1727_v0 }
 0x1a7   :  { %v273_v25 = vpop.f32.mrb[0].mxu0 }
 0x1a8   :  { %v274_v26 = vadd.f32 %v1076_v24, %v273_v25  ;;  %v1238_v27 = vpop.f32.mrb[1].mxu0  ;;  %v1112_v24 = vld [vmem:[#allocation5 + $0x4] ss:$0 sm:$0xff] }
 0x1a9   :  { %v276_v28 = vpop.f32.mrb[2].mxu0 }
 0x1aa   :  { %v279_v29 = vmax.f32 %v274_v26, 0.0  ;;  %v1239_v30 = vpop.f32.mrb[3].mxu0 }
 0x1ac   :  { %v280_v31 = vpack.c.bf16 %v279_v29, %v279_v29 }
 0x1ae   :  { %1257 = vmatmul.mubr.bf16.vlgmr.msra.gmra.mrb[0].mxu1 %v280_v31 }
 0x1af   :  { %1296 = vmatprep.mubr.msk.bf16.mxu1 %vm1728_vm0, %v1727_v0  ;;  %1281 = vmatpush3.bf16.msra.mxu1 %v1419_v34  ;;  %v1451_v34 = vld [vmem:[#allocation17] sm:$0xff]  }
 0x1b0   :  { %1282 = vmatprep.subr.bf16.mxu1 %v1727_v0 }
 0x1b3   :  { %1283 = vmatpush3.bf16.msra.mxu1 %v1420_v35  ;;  %v1452_v35 = vld [vmem:[#allocation17 + $0x8] sm:$0xff]  }
 0x1b4   :  { %1284 = vmatprep.subr.bf16.mxu1 %v1727_v0 }
 0x1b7   :  { %1285 = vmatpush3.bf16.msra.mxu1 %v1421_v36  ;;  %v1453_v36 = vld [vmem:[#allocation17 + $0x10] sm:$0xff]  }
 0x1b8   :  { %1286 = vmatprep.subr.bf16.mxu1 %v1727_v0 }
 0x1bb   :  { %1287 = vmatpush3.bf16.msra.mxu1 %v1422_v37  ;;  %v1454_v37 = vld [vmem:[#allocation17 + $0x18] sm:$0xff]  }
 0x1bc   :  { %1288 = vmatprep.subr.bf16.mxu1 %v1727_v0 }
 0x1bf   :  { %1289 = vmatpush3.bf16.msra.mxu1 %v1423_v38  ;;  %v1455_v38 = vld [vmem:[#allocation17 + $0x20] sm:$0xff]  }
 0x1c0   :  { %1290 = vmatprep.subr.bf16.mxu1 %v1727_v0 }
 0x1c3   :  { %1291 = vmatpush3.bf16.msra.mxu1 %v1424_v39  ;;  %v1456_v39 = vld [vmem:[#allocation17 + $0x28] sm:$0xff]  }
 0x1c4   :  { %1292 = vmatprep.subr.bf16.mxu1 %v1727_v0 }
 0x1c7   :  { %1293 = vmatpush3.bf16.msra.mxu1 %v1425_v48  ;;  %v1457_v48 = vld [vmem:[#allocation17 + $0x30] sm:$0xff]  }
 0x1c8   :  { %1294 = vmatprep.subr.bf16.mxu1 %v1727_v0 }
 0x1cb   :  { %1295 = vmatpush3.bf16.msra.mxu1 %v1426_v49  ;;  %v1458_v49 = vld [vmem:[#allocation17 + $0x38] sm:$0xff]  }
 0x1cc   :  { %1320 = vmatprep.subr.bf16.mxu1 %v1727_v0 }
 0x281   :  { %v384_v41 = vpop.f32.mrb[0].mxu1 }
 0x282   :  { %v385_v42 = vadd.f32 %v1085_v40, %v384_v41  ;;  %v1258_v43 = vpop.f32.mrb[1].mxu1  ;;  %v1121_v40 = vld [vmem:[#allocation5 + $0x5] ss:$0 sm:$0xff] }
 0x283   :  { %v387_v44 = vpop.f32.mrb[2].mxu1 }
 0x284   :  { %v390_v45 = vmax.f32 %v385_v42, 0.0  ;;  %v1259_v46 = vpop.f32.mrb[3].mxu1 }
 0x286   :  { %v391_v47 = vpack.c.bf16 %v390_v45, %v390_v45 }
 0x288   :  { %1277 = vmatmul.mubr.bf16.vlgmr.msra.gmra.mrb[4].mxu0 %v391_v47 }
 0x289   :  { %1316 = vmatprep.mubr.msk.bf16.mxu0 %vm1728_vm0, %v1727_v0  ;;  %1301 = vmatpush3.bf16.msra.mxu0 %v1427_v50  ;;  %v1130_v50 = vld [vmem:[#allocation5 + $0x6] ss:$0 sm:$0xff] }
 0x28a   :  { %1302 = vmatprep.subr.bf16.mxu0 %v1727_v0 }
 0x28d   :  { %1303 = vmatpush3.bf16.msra.mxu0 %v1428_v51 }
 0x28e   :  { %1304 = vmatprep.subr.bf16.mxu0 %v1727_v0 }
 0x291   :  { %1305 = vmatpush3.bf16.msra.mxu0 %v1429_v52 }
 0x292   :  { %1306 = vmatprep.subr.bf16.mxu0 %v1727_v0 }
 0x295   :  { %1307 = vmatpush3.bf16.msra.mxu0 %v1430_v53 }
 0x296   :  { %1308 = vmatprep.subr.bf16.mxu0 %v1727_v0 }
 0x299   :  { %1309 = vmatpush3.bf16.msra.mxu0 %v1431_v54 }
 0x29a   :  { %1310 = vmatprep.subr.bf16.mxu0 %v1727_v0 }
 0x29d   :  { %1311 = vmatpush3.bf16.msra.mxu0 %v1432_v55 }
 0x29e   :  { %1312 = vmatprep.subr.bf16.mxu0 %v1727_v0 }
 0x2a1   :  { %1313 = vmatpush3.bf16.msra.mxu0 %v1433_v56 }
 0x2a2   :  { %1314 = vmatprep.subr.bf16.mxu0 %v1727_v0 }
 0x2a5   :  { %1315 = vmatpush3.bf16.msra.mxu0 %v1434_v2 }
 0x2a6   :  { %1340 = vmatprep.subr.bf16.mxu0 %v1727_v0 }
 0x35b   :  { %v495_v58 = vpop.f32.mrb[4].mxu0 }
 0x35c   :  { %v496_v59 = vadd.f32 %v1094_v57, %v495_v58  ;;  %v1278_v60 = vpop.f32.mrb[5].mxu0  ;;  %v1139_v58 = vld [vmem:[#allocation5 + $0x7] ss:$0 sm:$0xff] }
 0x35d   :  { %v498_v61 = vpop.f32.mrb[6].mxu0 }
 0x35e   :  { %v501_v62 = vmax.f32 %v496_v59, 0.0  ;;  %v1279_v63 = vpop.f32.mrb[7].mxu0 }
 0x360   :  { %v502_v1 = vpack.c.bf16 %v501_v62, %v501_v62 }
 0x362   :  { %1297 = vmatmul.mubr.bf16.vlgmr.msra.gmra.mrb[4].mxu1 %v502_v1 }
 0x363   :  { %1336 = vmatprep.mubr.msk.bf16.mxu1 %vm1728_vm0, %v1727_v0  ;;  %1321 = vmatpush3.bf16.msra.mxu1 %v1435_v3 }
 0x364   :  { %1322 = vmatprep.subr.bf16.mxu1 %v1727_v0 }
 0x367   :  { %1323 = vmatpush3.bf16.msra.mxu1 %v1436_v4 }
 0x368   :  { %1324 = vmatprep.subr.bf16.mxu1 %v1727_v0 }
 0x36b   :  { %1325 = vmatpush3.bf16.msra.mxu1 %v1437_v5 }
 0x36c   :  { %1326 = vmatprep.subr.bf16.mxu1 %v1727_v0 }
 0x36f   :  { %1327 = vmatpush3.bf16.msra.mxu1 %v1438_v6 }
 0x370   :  { %1328 = vmatprep.subr.bf16.mxu1 %v1727_v0 }
 0x373   :  { %1329 = vmatpush3.bf16.msra.mxu1 %v1439_v7 }
 0x374   :  { %1330 = vmatprep.subr.bf16.mxu1 %v1727_v0 }
 0x377   :  { %1331 = vmatpush3.bf16.msra.mxu1 %v1440_v8 }
 0x378   :  { %1332 = vmatprep.subr.bf16.mxu1 %v1727_v0 }
 0x37b   :  { %1333 = vmatpush3.bf16.msra.mxu1 %v1441_v16 }
 0x37c   :  { %1334 = vmatprep.subr.bf16.mxu1 %v1727_v0 }
 0x37f   :  { %1335 = vmatpush3.bf16.msra.mxu1 %v1442_v17 }
 0x380   :  { %1360 = vmatprep.subr.bf16.mxu1 %v1727_v0 }
 0x435   :  { %v606_v10 = vpop.f32.mrb[4].mxu1 }
 0x436   :  { %v607_v11 = vadd.f32 %v1103_v9, %v606_v10  ;;  %v1298_v12 = vpop.f32.mrb[5].mxu1 }
 0x437   :  { %v609_v13 = vpop.f32.mrb[6].mxu1 }
 0x438   :  { %v612_v14 = vpack.c.bf16 %v607_v11, %v607_v11  ;;  %v1299_v15 = vpop.f32.mrb[7].mxu1 }
 0x43a   :  { %1317 = vmatmul.mubr.bf16.vlgmr.msra.gmra.mrb[8].mxu0 %v612_v14 }
 0x43b   :  { %1356 = vmatprep.mubr.msk.bf16.mxu0 %vm1728_vm0, %v1727_v0  ;;  %1341 = vmatpush3.bf16.msra.mxu0 %v1443_v18 }
 0x43c   :  { %1342 = vmatprep.subr.bf16.mxu0 %v1727_v0 }
 0x43f   :  { %1343 = vmatpush3.bf16.msra.mxu0 %v1444_v19 }
 0x440   :  { %1344 = vmatprep.subr.bf16.mxu0 %v1727_v0 }
 0x443   :  { %1345 = vmatpush3.bf16.msra.mxu0 %v1445_v20 }
 0x444   :  { %1346 = vmatprep.subr.bf16.mxu0 %v1727_v0 }
 0x447   :  { %1347 = vmatpush3.bf16.msra.mxu0 %v1446_v21 }
 0x448   :  { %1348 = vmatprep.subr.bf16.mxu0 %v1727_v0 }
 0x44b   :  { %1349 = vmatpush3.bf16.msra.mxu0 %v1447_v22 }
 0x44c   :  { %1350 = vmatprep.subr.bf16.mxu0 %v1727_v0 }
 0x44f   :  { %1351 = vmatpush3.bf16.msra.mxu0 %v1448_v23 }
 0x450   :  { %1352 = vmatprep.subr.bf16.mxu0 %v1727_v0 }
 0x453   :  { %1353 = vmatpush3.bf16.msra.mxu0 %v1449_v32 }
 0x454   :  { %1354 = vmatprep.subr.bf16.mxu0 %v1727_v0 }
 0x457   :  { %1355 = vmatpush3.bf16.msra.mxu0 %v1450_v33 }
 0x50d   :  { %v716_v25 = vpop.f32.mrb[8].mxu0 }
 0x50e   :  { %v717_v26 = vadd.f32 %v1112_v24, %v716_v25  ;;  %v1318_v27 = vpop.f32.mrb[9].mxu0 }
 0x50f   :  { %v719_v28 = vpop.f32.mrb[10].mxu0 }
 0x510   :  { %v722_v29 = vmax.f32 %v717_v26, 0.0  ;;  %v1319_v30 = vpop.f32.mrb[11].mxu0 }
 0x512   :  { %v723_v31 = vpack.c.bf16 %v722_v29, %v722_v29 }
 0x514   :  { %1337 = vmatmul.mubr.bf16.vlgmr.msra.gmra.mrb[8].mxu1 %v723_v31 }
 0x515   :  { %1376 = vmatprep.mubr.msk.bf16.mxu1 %vm1728_vm0, %v1727_v0  ;;  %1361 = vmatpush3.bf16.msra.mxu1 %v1451_v34 }
 0x516   :  { %1362 = vmatprep.subr.bf16.mxu1 %v1727_v0 }
 0x519   :  { %1363 = vmatpush3.bf16.msra.mxu1 %v1452_v35 }
 0x51a   :  { %1364 = vmatprep.subr.bf16.mxu1 %v1727_v0 }
 0x51d   :  { %1365 = vmatpush3.bf16.msra.mxu1 %v1453_v36 }
 0x51e   :  { %1366 = vmatprep.subr.bf16.mxu1 %v1727_v0 }
 0x521   :  { %1367 = vmatpush3.bf16.msra.mxu1 %v1454_v37 }
 0x522   :  { %1368 = vmatprep.subr.bf16.mxu1 %v1727_v0 }
 0x525   :  { %1369 = vmatpush3.bf16.msra.mxu1 %v1455_v38 }
 0x526   :  { %1370 = vmatprep.subr.bf16.mxu1 %v1727_v0 }
 0x529   :  { %1371 = vmatpush3.bf16.msra.mxu1 %v1456_v39 }
 0x52a   :  { %1372 = vmatprep.subr.bf16.mxu1 %v1727_v0 }
 0x52d   :  { %1373 = vmatpush3.bf16.msra.mxu1 %v1457_v48 }
 0x52e   :  { %1374 = vmatprep.subr.bf16.mxu1 %v1727_v0 }
 0x531   :  { %1375 = vmatpush3.bf16.msra.mxu1 %v1458_v49 }
 0x5e7   :  { %v827_v41 = vpop.f32.mrb[8].mxu1 }
 0x5e8   :  { %v828_v42 = vadd.f32 %v1121_v40, %v827_v41  ;;  %v1338_v43 = vpop.f32.mrb[9].mxu1 }
 0x5e9   :  { %v830_v44 = vpop.f32.mrb[10].mxu1 }
 0x5ea   :  { %v833_v45 = vmax.f32 %v828_v42, 0.0  ;;  %v1339_v46 = vpop.f32.mrb[11].mxu1 }
 0x5ec   :  { %v834_v47 = vpack.c.bf16 %v833_v45, %v833_v45 }
 0x5ee   :  { %1357 = vmatmul.mubr.bf16.vlgmr.msra.gmra.mrb[12].mxu0 %v834_v47 }
 0x6c1   :  { %v938_v51 = vpop.f32.mrb[12].mxu0 }
 0x6c2   :  { %v939_v52 = vadd.f32 %v1130_v50, %v938_v51  ;;  %v1358_v53 = vpop.f32.mrb[13].mxu0 }
 0x6c3   :  { %v941_v54 = vpop.f32.mrb[14].mxu0 }
 0x6c4   :  { %v944_v55 = vmax.f32 %v939_v52, 0.0  ;;  %v1359_v56 = vpop.f32.mrb[15].mxu0 }
 0x6c6   :  { %v945_v57 = vpack.c.bf16 %v944_v55, %v944_v55 }
 0x6c8   :  { %1377 = vmatmul.mubr.bf16.vlgmr.msra.gmra.mrb[12].mxu1 %v945_v57 }
 0x79b   :  { %v1049_v59 = vpop.f32.mrb[12].mxu1 }
 0x79c   :  { %v1050_v60 = vadd.f32 %v1139_v58, %v1049_v59  ;;  %v1378_v61 = vpop.f32.mrb[13].mxu1 }
 0x79d   :  { %v1052_v62 = vpop.f32.mrb[14].mxu1 }
 0x79e   :  { %1055 = vst [vmem:[#allocation19] sm:$0xff] %v1050_v60  ;;  %v1379_v0 = vpop.f32.mrb[15].mxu1 }
 0x79f   :  { %1690 = shalt.err (!%p1687_p0)
}
 0x7a0   :  { %s1691_s4 = scalar_lea.hbm %s2031_s10, 128 }
 0x7a1   :  { %p1692_p1 = scmp.ne.s32.totalorder %s2031_s10, %s1691_s4  ;;  %p1695_p2 = scmp.lt.u32.totalorder %s1691_s4, %s2031_s10 }
 0x7a3   :  { %p1697_p3 = pnand %p1695_p2, %p1692_p1 }
 0x7a5   :  { %1700 = shalt.err (!%p1697_p3)
}
 0x7a6   :  { %1065 = dma.vmem_to_hbm [thread:$0]  %s1063_s14, 128, %s2031_s10, [#allocation4]  }
 0x7a7   :  { %1713 = dma.done.wait [#allocation4], 128  }
 0x7a8   :  { %1714 = vsyncadd [#allocation4], 4294967168 }
 0x7a9   :  { %1069 = vsyncpa [#allocation3], 1 }
 0x7aa   :  { %1070 = vsyncpa [#allocation6], 1 }
 0x7ab   :  { %1071 = vsyncpa [#allocation9], 1 }
 0x7ac   :  { %1072 = vsyncpa [#allocation12], 1 }
 0x7ad   :  { %1073 = vsyncpa [#allocation15], 1 }
 0x7ae   :  { %1074 = vsyncpa [#allocation18], 1 }
 0x7af   :  { %1075 = vsyncpa [#allocation4], 1 }

</bundles_post_ra>
